<compile_context>
chip_gen: v6e
topology: v6e:2x2x1
jax: 0.10.0
libtpu: 0.0.40
codegen_flags: <defaults>
</compile_context>

<pallas_src>
import jax
import jax.numpy as jnp
from jax.experimental import pallas as pl
from jax.experimental.pallas import tpu as pltpu


def _make_kernel(compute_dtype):
    def classification_kernel(x_ref, w_ref, b_ref, o_ref):
        # x_ref: (tm, E) f32 | w_ref: (E, C) f32 | b_ref: (1, C) f32 | o_ref: (tm, C) f32
        # Cast MXU operands inside the kernel (no separate HBM conversion pass);
        # accumulation and all softmax math stay in f32 (v5e-safe).
        x = x_ref[...].astype(compute_dtype)
        w = w_ref[...].astype(compute_dtype)
        logits = jnp.dot(x, w, preferred_element_type=jnp.float32) + b_ref[...]
        # numerically stable log_softmax along the class axis
        m = jnp.max(logits, axis=-1, keepdims=True)
        shifted = logits - m
        lse = jnp.log(jnp.sum(jnp.exp(shifted), axis=-1, keepdims=True))
        o_ref[...] = (shifted - lse).astype(o_ref.dtype)

    return classification_kernel


def _vmem_capacity_bytes():
    try:
        return int(pltpu.get_tpu_info().vmem_capacity_bytes)
    except Exception:
        return 64 * 1024 * 1024  # conservative fallback (v7x per-TC VMEM)


def classification_forward(embeds, weight, bias, *, tile_m=None,
                           compute_dtype=jnp.bfloat16):
    """log_softmax(embeds @ weight + bias, axis=1).

    embeds: (N, E) f32; weight: (E, C) f32 (transpose of nn.Linear.weight);
    bias: (C,) f32  ->  (N, C) f32.

    compute_dtype: MXU operand dtype.  Default bf16 (HBM-bound kernel, ~1e-2
    logit error vs f32); pass jnp.float32 for exact-parity numerics — HBM
    traffic is identical either way since the cast happens in-kernel.
    """
    N, E = embeds.shape
    E2, C = weight.shape
    assert E2 == E and bias.shape == (C,)
    out_dtype = embeds.dtype

    x = embeds                                  # streamed as-is; cast in-kernel
    w = weight.astype(jnp.float32)
    b2 = bias.astype(jnp.float32).reshape(1, C)

    # ---- per-generation VMEM budget (v5e/v6e: 128 MiB, v7x: 64 MiB) ---------
    vmem_cap = _vmem_capacity_bytes()
    budget = (vmem_cap * 3) // 4                # ~96 MiB v5e/v6e, ~48 MiB v7x

    x_bytes = jnp.dtype(x.dtype).itemsize       # 4 (f32 streamed)
    o_bytes = jnp.dtype(out_dtype).itemsize     # 4

    # Resident operands (constant block index -> never re-DMA'd).  Counted with
    # 2 buffers to stay conservative; add pipeline_mode=pl.Buffered(1) to their
    # BlockSpecs only once E*C approaches the VMEM budget.
    fixed = 2 * E * C * 4 + 2 * 2 * C * 4
    per_row = 2 * E * x_bytes + 2 * C * o_bytes  # double-buffered x + out tiles

    def footprint(t):
        return fixed + t * per_row

    n_pad = ((N + 7) // 8) * 8
    MAX_TM = 16384                 # big tiles amortize ~0.35 us per grid step
    if tile_m is None:
        tm = (budget - fixed) // per_row
        tm = max(8, min(tm, MAX_TM, n_pad))
        tm = (tm // 8) * 8
    else:
        tm = max(8, (int(tile_m) // 8) * 8)
        tm = min(tm, n_pad)
    while footprint(tm) > budget and tm > 8:
        tm = max(8, ((tm // 2) // 8) * 8)

    compiler_kwargs = dict(
        # Row axis is embarrassingly parallel: "parallel" lets the runtime shard
        # grid steps across v7x's 2 TensorCores (no-op on v5e/v6e's single TC).
        dimension_semantics=("parallel",),
    )
    fp = footprint(tm)
    if fp > 32 * 1024 * 1024:      # above the conservative scoped-VMEM default
        compiler_kwargs["vmem_limit_bytes"] = int(
            min(vmem_cap - (8 << 20), fp + (4 << 20)))

    cost = pl.CostEstimate(
        flops=2 * N * E * C,
        transcendentals=N * C + N,               # exp per logit + log per row
        bytes_accessed=(N * E * x_bytes + E * C * 4 + C * 4 + N * C * o_bytes),
    )

    return pl.pallas_call(
        _make_kernel(compute_dtype),
        out_shape=jax.ShapeDtypeStruct((N, C), out_dtype),
        grid_spec=pltpu.PrefetchScalarGridSpec(
            num_scalar_prefetch=0,
            grid=(pl.cdiv(N, tm),),
            in_specs=[
                pl.BlockSpec((tm, E), lambda i: (i, 0)),
                pl.BlockSpec((E, C), lambda i: (0, 0)),   # resident: constant index
                pl.BlockSpec((1, C), lambda i: (0, 0)),   # resident: constant index
            ],
            out_specs=pl.BlockSpec((tm, C), lambda i: (i, 0)),
        ),
        compiler_params=pltpu.CompilerParams(**compiler_kwargs),
        cost_estimate=cost,
    )(x, w, b2)


def init_params(key, emb_size, num_classes):
    """Deterministic params matching the module's __init__ shapes.

    PyTorch weight is (num_classes, emb_size) with xavier_uniform_; we store its
    transpose (emb_size, num_classes).  Bias keeps nn.Linear's default uniform
    init (the module's init_params only re-initializes 2-D params).
    """
    kw, kb = jax.random.split(key)
    bound_w = (6.0 / (emb_size + num_classes)) ** 0.5   # xavier uniform
    weight = jax.random.uniform(kw, (emb_size, num_classes),
                                minval=-bound_w, maxval=bound_w,
                                dtype=jnp.float32)
    bound_b = 1.0 / (emb_size ** 0.5)
    bias = jax.random.uniform(kb, (num_classes,),
                              minval=-bound_b, maxval=bound_b,
                              dtype=jnp.float32)
    return weight, bias


if __name__ == "__main__":
    key = jax.random.PRNGKey(0)
    k_x1, k_x2, k_p = jax.random.split(key, 3)

    emb_size, num_classes = 32, 8
    weight, bias = init_params(k_p, emb_size, num_classes)

    # Case 1: small batch matching the module's typical use (auto tile_m)
    N1 = 8
    x1 = jax.random.normal(k_x1, (N1, emb_size), dtype=jnp.float32)
    out1 = jax.block_until_ready(classification_forward(x1, weight, bias))
    ref1 = jax.nn.log_softmax(x1 @ weight + bias, axis=1)
    assert out1.shape == (N1, num_classes)
    assert jnp.allclose(out1, ref1, atol=5e-2, rtol=5e-2), "mismatch (case 1)"

    # Case 2: ragged N with an explicit small tile -> multi-step grid and a
    # partial trailing block (exercises the cdiv grid path).
    N2 = 300
    x2 = jax.random.normal(k_x2, (N2, emb_size), dtype=jnp.float32)
    out2 = jax.block_until_ready(
        classification_forward(x2, weight, bias, tile_m=128))
    ref2 = jax.nn.log_softmax(x2 @ weight + bias, axis=1)
    assert out2.shape == (N2, num_classes)
    assert jnp.allclose(out2, ref2, atol=5e-2, rtol=5e-2), "mismatch (case 2)"

    print("KERNEL_OK")
</pallas_src>

<mosaic_0001>
module attributes {stable_mosaic.version = 11 : i64} {
  func.func @classification_kernel(%arg0: i32, %arg1: memref<8x32xf32, #tpu.memory_space<vmem>>, %arg2: memref<32x8xf32, #tpu.memory_space<vmem>>, %arg3: memref<1x8xf32, #tpu.memory_space<vmem>>, %arg4: memref<8x8xf32, #tpu.memory_space<vmem>>) attributes {dimension_semantics = [#tpu.dimension_semantics<parallel>], iteration_bounds = array<i64: 1>, scalar_prefetch = 0 : i64, scratch_operands = 0 : i64, tpu.core_type = #tpu.core_type<tc>, window_params = [{transform_indices = @transform_0, window_bounds = array<i64: 8, 32>}, {pipeline_mode = #tpu.pipeline_mode<synchronous>, transform_indices = @transform_1, window_bounds = array<i64: 32, 8>}, {pipeline_mode = #tpu.pipeline_mode<synchronous>, transform_indices = @transform_2, window_bounds = array<i64: 1, 8>}, {transform_indices = @transform_3, window_bounds = array<i64: 8, 8>}]} {
    %c0 = arith.constant 0 : index
    %c0_0 = arith.constant 0 : index
    %0 = vector.load %arg1[%c0, %c0_0] : memref<8x32xf32, #tpu.memory_space<vmem>>, vector<8x32xf32>
    %1 = arith.truncf %0 : vector<8x32xf32> to vector<8x32xbf16>
    %c0_1 = arith.constant 0 : index
    %c0_2 = arith.constant 0 : index
    %2 = vector.load %arg2[%c0_1, %c0_2] : memref<32x8xf32, #tpu.memory_space<vmem>>, vector<32x8xf32>
    %3 = arith.truncf %2 : vector<32x8xf32> to vector<32x8xbf16>
    %cst = arith.constant dense<0.000000e+00> : vector<8x8xf32>
    %4 = tpu.matmul %1, %3, %cst {dimension_numbers = #tpu.dot_dimension_numbers<[1], [0], [0], [1], [0, 0, 1, 1], [], []>} : vector<8x32xbf16>, vector<32x8xbf16>, vector<8x8xf32> -> vector<8x8xf32>
    %c0_3 = arith.constant 0 : index
    %c0_4 = arith.constant 0 : index
    %5 = vector.load %arg3[%c0_3, %c0_4] : memref<1x8xf32, #tpu.memory_space<vmem>>, vector<1x8xf32>
    %6 = vector.broadcast %5 : vector<1x8xf32> to vector<8x8xf32>
    %7 = arith.addf %4, %6 : vector<8x8xf32>
    %cst_5 = arith.constant dense<0xFF800000> : vector<8xf32>
    %8 = vector.multi_reduction <maximumf>, %7, %cst_5 [1] : vector<8x8xf32> to vector<8xf32>
    %9 = vector.shape_cast %8 : vector<8xf32> to vector<8x1xf32>
    %10 = vector.broadcast %9 : vector<8x1xf32> to vector<8x8xf32>
    %11 = arith.subf %7, %10 : vector<8x8xf32>
    %12 = math.exp %11 : vector<8x8xf32>
    %cst_6 = arith.constant dense<0.000000e+00> : vector<8xf32>
    %13 = vector.multi_reduction <add>, %12, %cst_6 [1] : vector<8x8xf32> to vector<8xf32>
    %14 = vector.shape_cast %13 : vector<8xf32> to vector<8x1xf32>
    %15 = math.log %14 : vector<8x1xf32>
    %16 = vector.broadcast %15 : vector<8x1xf32> to vector<8x8xf32>
    %17 = arith.subf %11, %16 : vector<8x8xf32>
    %c0_7 = arith.constant 0 : index
    %c0_8 = arith.constant 0 : index
    %18 = vector.load %arg4[%c0_7, %c0_8] : memref<8x8xf32, #tpu.memory_space<vmem>>, vector<8x8xf32>
    tpu.vector_store %arg4[%c0_7, %c0_8], %17 {strides = array<i32>} : memref<8x8xf32, #tpu.memory_space<vmem>>, vector<8x8xf32>,
    return
  }
  func.func @transform_0(%arg0: i32) -> (i32, i32) {
    %c0_i32 = arith.constant 0 : i32
    %c0_i32_0 = arith.constant 0 : i32
    return %arg0, %c0_i32 : i32, i32
  }
  func.func @transform_1(%arg0: i32) -> (i32, i32) {
    %c0_i32 = arith.constant 0 : i32
    %c0_i32_0 = arith.constant 0 : i32
    %c0_i32_1 = arith.constant 0 : i32
    return %c0_i32, %c0_i32_0 : i32, i32
  }
  func.func @transform_2(%arg0: i32) -> (i32, i32) {
    %c0_i32 = arith.constant 0 : i32
    %c0_i32_0 = arith.constant 0 : i32
    %c0_i32_1 = arith.constant 0 : i32
    return %c0_i32, %c0_i32_0 : i32, i32
  }
  func.func @transform_3(%arg0: i32) -> (i32, i32) {
    %c0_i32 = arith.constant 0 : i32
    %c0_i32_0 = arith.constant 0 : i32
    return %arg0, %c0_i32 : i32, i32
  }
}

</mosaic_0001>

<bundles_post_ra>
// kernel: tpu_custom_call.1
= control target key start
LH: loop header
LB: loop body
LE: loop exit
PB: predicated region body
PF: predicated region fallthrough
CT: control target
= control target key end

     0   :  { %v145_v3 = vmov 0.0   ;;  %vm146_vm0 = vmmov 0   ;;  %s192_s0 = inlined_call_operand.vmem [shape: f32[8,32], index: 0, kind: input, shape index: {}]   ;;  %s193_s1 = inlined_call_operand.vmem [shape: f32[32,8], index: 1, kind: input, shape index: {}]   ;;  %s194_s2 = inlined_call_operand.vmem [shape: f32[1,8], index: 2, kind: input, shape index: {}]   ;;  %s195_s3 = inlined_call_operand.hbm [shape: f32[8,8], index: 3, kind: output, shape index: {}]  }
   0x1   :  { %v20_v0 = vld [vmem:[%s193_s1 + $0x10] sm:$0xff]  ;;  %v21_v1 = vld [vmem:[%s193_s1 + $0x18] sm:$0xff]  ;;  %v18_v2 = vld [vmem:[%s193_s1] sm:$0xff]  ;;  %108 = vmatprep.subr.bf16.mxu0 %v145_v3  ;;  %112 = vmatprep.mubr.msk.bf16.mxu0 %vm146_vm0, %v145_v3 }
   0x2   :  { %v23_v4 = vpack.c.bf16 %v21_v1, %v20_v0  ;;  %v19_v5 = vld [vmem:[%s193_s1 + $0x8] sm:$0xff] }
   0x3   :  { %8 = vsyncpa [#allocation3], 0  ;;  %v22_v6 = vpack.c.bf16 %v19_v5, %v18_v2  ;;  %v16_v7 = vld [vmem:[%s192_s0] sm:$0xff]  ;;  %vm31_vm1 = vcmask 261120   ;;  %vm75_vm2 = vcmask 64512   ;;  %s147_s0 = smov [#allocation2]  }
   0x4   :  { %109 = vmatpush3.bf16.msra.mxu0 %v23_v4  ;;  %v17_v8 = vpack.c.bf16 %v16_v7, %v16_v7  ;;  %v103_v9 = vld [vmem:[%s194_s2] ss:$0 sm:$0xff]  ;;  %s95_s1 = sshll.u32 %s147_s0, 4  ;;  %s96_s1 = int_to_ptr.vmem [resolvable:$true] %s95_s1 }
   0x5   :  { %110 = vmatprep.subr.bf16.mxu0 %v145_v3  ;;  %s123_s2 = scalar_lea.vmem %s96_s1, 128  ;;  %p128_p1 = scmp.lt.s32.totalorder %s96_s1, %s96_s1 }
   0x6   :  { %p124_p0 = scmp.ne.s32.totalorder %s96_s1, %s123_s2  ;;  %p129_p2 = scmp.lt.s32.totalorder %s123_s2, %s123_s2 }
   0x8   :  { %111 = vmatpush3.bf16.msra.mxu0 %v22_v6  ;;  %p130_p3 = por %p129_p2, %p128_p1 }
   0xa   :  { %p131_p4 = pnand %p130_p3, %p124_p0 }
   0xb   :  { %113 = vmatmul.mubr.msk.bf16.vlgmr.msra.gmra.mxu0 %vm31_vm1, %v17_v8 }
  0xcb   :  { %v69_v10 = vpop.f32.mrf.mxu0 }
  0xcc   :  { %v70_v11 = vadd.f32 %v103_v9, %v69_v10 }
  0xcd   :  { %v114_v12 = vpop.f32.mrf.mxu0 }
  0xce   :  { %v76_v13 = vsel %vm75_vm2, %v70_v11, -inf }
  0xcf   :  { %77 = vmax.xlane.f32.xlu0 %v76_v13  ;;  %v72_v14 = vpop.f32.mrf.mxu0 }
  0xd1   :  { %v115_v15 = vpop.f32.mrf.mxu0 }
 0x158   :  { %v78_v16 = vpop.xlane.xlu0 %77 }
 0x159   :  { %v79_v17 = vsub.f32 %v70_v11, %v78_v16 }
 0x15b   :  { %v80_v18 = vmul.f32 1.442695, %v79_v17 }
 0x15d   :  { %119 = vpow2.f32 %v80_v18 }
 0x16a   :  { %v120_v19 = vpop.eup %119 }
 0x16b   :  { %v82_v20 = vsel %vm75_vm2, %v120_v19, 0.0 }
 0x16c   :  { %83 = vadd.xlane.f32.xlu0 %v82_v20 }
 0x1f5   :  { %v84_v21 = vpop.xlane.xlu0 %83 }
 0x1f6   :  { %121 = vlog2.f32 %v84_v21 }
 0x203   :  { %v122_v22 = vpop.eup %121 }
 0x204   :  { %v86_v23 = vmul.f32 0.6931472, %v122_v22 }
 0x206   :  { %v87_v24 = vsub.f32 %v79_v17, %v86_v23 }
 0x208   :  { %88 = vst.msk [vmem:[#allocation2] sm:$0xff] %vm75_vm2, %v87_v24 }
 0x209   :  { %134 = shalt.err (!%p131_p4)
}
 0x20a   :  { %98 = dma.vmem_to_hbm [thread:$0]  %s96_s1, 128, %s195_s3, [#allocation3]  }
 0x20b   :  { %143 = dma.done.wait [#allocation3], 128  }
 0x20c   :  { %144 = vsyncadd [#allocation3], 4294967168 }
 0x20d   :  { %102 = vsyncpa [#allocation3], 1 }

</bundles_post_ra>
